<compile_context>
chip_gen: v7x
topology: tpu7x:2x2x1
jax: 0.10.0
libtpu: 0.0.40
codegen_flags: <defaults>
</compile_context>

<pallas_src>
import math

import jax
import jax.numpy as jnp
from jax import lax
from jax.experimental import pallas as pl
from jax.experimental.pallas import tpu as pltpu

MASK_VALUE = -1e30


def _pad2(rows, cols):
    """Elements of a (rows, cols) block after (8, 128) tile padding."""
    return ((rows + 7) // 8 * 8) * ((cols + 127) // 128 * 128)


def _qkv_proj_kernel(x_ref, w_ref, b_ref, q_ref, k_ref, v_ref):
    # x_ref: (1, TM, E) f32; w_ref: (3, E, E) bf16; b_ref: (3, 1, E) f32.
    x = x_ref[0].astype(jnp.bfloat16)                      # cast once, reuse 3x
    for i, out_ref in enumerate((q_ref, k_ref, v_ref)):
        # Leading-dim ref slice (free view); weights already bf16.
        y = jnp.dot(x, w_ref[i], preferred_element_type=jnp.float32) + b_ref[i]
        out_ref[0] = y.astype(out_ref.dtype)


def _flash_attn_kernel(qi_ref, kv_ref, q_ref, k_ref, v_ref, wp_ref, bp_ref,
                       o_ref, m_ref, l_ref, acc_ref):
    # Triangular flattened grid: axis 0 = batch, axis 1 = (qi, kv) pair index.
    t = pl.program_id(1)
    qi = qi_ref[t]
    kv = kv_ref[t]
    tq = q_ref.shape[1]
    tk = k_ref.shape[1]

    @pl.when(kv == 0)                       # first kv tile of this q row
    def _init():
        m_ref[...] = jnp.full_like(m_ref, MASK_VALUE)
        l_ref[...] = jnp.zeros_like(l_ref)
        acc_ref[...] = jnp.zeros_like(acc_ref)

    q = q_ref[0]                            # (TQ, E) bf16, pre-scaled by 1/sqrt(E)
    k = k_ref[0]                            # (TK, E) bf16
    # Contract last dims directly: no K transpose / relayout before the MXU.
    s = lax.dot_general(q, k, (((1,), (1,)), ((), ())),
                        preferred_element_type=jnp.float32)

    # Causal mask only on the diagonal tile; interior tiles (kv < qi) are fully
    # unmasked (requires tq == tk, asserted in the wrapper).
    def _mask(sv):
        row = lax.broadcasted_iota(jnp.int32, (tq, tk), 0)
        col = lax.broadcasted_iota(jnp.int32, (tq, tk), 1)
        return jnp.where(col <= row, sv, MASK_VALUE)

    s = lax.cond(kv == qi, _mask, lambda sv: sv, s)

    m_prev = m_ref[...]
    m_new = jnp.maximum(m_prev, jnp.max(s, axis=-1, keepdims=True))
    alpha = jnp.exp(m_prev - m_new)
    p = jnp.exp(s - m_new)                  # f32 softmax numerators
    l_ref[...] = alpha * l_ref[...] + jnp.sum(p, axis=-1, keepdims=True)
    acc_ref[...] = alpha * acc_ref[...] + jnp.dot(
        p.astype(v_ref.dtype), v_ref[0], preferred_element_type=jnp.float32)
    m_ref[...] = m_new

    # In the triangular ordering the diagonal tile is the last kv tile of the
    # row -> finalize (normalize + fused output projection) there.
    @pl.when(kv == qi)
    def _finalize():
        att = acc_ref[...] * pl.reciprocal(l_ref[...], approx=True)  # (TQ, E) f32
        out = jnp.dot(att.astype(jnp.bfloat16), wp_ref[...],
                      preferred_element_type=jnp.float32) + bp_ref[...]
        o_ref[0] = out.astype(o_ref.dtype)


def multi_head_attention(x, w_qkv, b_qkv, w_proj, b_proj, *, tq=256, tm=512):
    """x: [B, S, E] f32. w_qkv: [E, 3E] (= Linear.weight.T), b_qkv: [3E],
    w_proj: [E, E] (= Linear.weight.T), b_proj: [E]. Returns [B, S, E]."""
    B, S, E = x.shape
    tq = min(tq, S)       # attention q/kv tile (use 128 on v5e's 128x128 MXU)
    tk = tq
    assert tq == tk, "causal tile skip / diagonal-only mask assume tq == tk"
    tm = min(tm, S)       # projection tile
    assert S % tq == 0 and S % tm == 0, "S must be divisible by the tile sizes"

    scale = 1.0 / math.sqrt(E)

    # (E, 3E) -> (3, E, E): q/k/v weights become leading-dim slices in-kernel.
    # Fold the 1/sqrt(E) softmax scale into the q projection (weight + bias),
    # then pre-cast weights to bf16 (halves weight DMA / resident VMEM).
    w3 = jnp.transpose(w_qkv.reshape(E, 3, E), (1, 0, 2))
    w3 = w3.at[0].multiply(scale).astype(jnp.bfloat16)
    b3 = b_qkv.reshape(3, 1, E).at[0].multiply(scale)          # f32 (added to f32 acc)
    wp = w_proj.astype(jnp.bfloat16)
    bp = b_proj.reshape(1, E)                                   # f32

    # --- QKV projection (bf16 MXU inputs, f32 accumulation, bf16 outputs) ---
    qkv_vmem = (2 * _pad2(tm, E) * 4            # x tile, double-buffered
                + 2 * 3 * _pad2(E, E) * 2       # w3 (bf16)
                + 2 * 3 * _pad2(1, E) * 4       # b3
                + 3 * 2 * _pad2(tm, E) * 2)     # q/k/v outputs (bf16)
    qkv_limit = int(min(max(2 * qkv_vmem, 8 << 20), 64 << 20))

    q, k, v = pl.pallas_call(
        _qkv_proj_kernel,
        out_shape=[jax.ShapeDtypeStruct((B, S, E), jnp.bfloat16)] * 3,
        grid=(B, S // tm),
        in_specs=[
            pl.BlockSpec((1, tm, E), lambda b, m: (b, m, 0)),
            pl.BlockSpec((3, E, E), lambda b, m: (0, 0, 0)),
            pl.BlockSpec((3, 1, E), lambda b, m: (0, 0, 0)),
        ],
        out_specs=[pl.BlockSpec((1, tm, E), lambda b, m: (b, m, 0))] * 3,
        compiler_params=pltpu.CompilerParams(
            dimension_semantics=("parallel", "parallel"),
            vmem_limit_bytes=qkv_limit),
    )(x, w3, b3)

    # --- flash attention + fused output projection on a triangular grid ---
    # Flatten the causal (qi, kv) space: only kv <= qi pairs exist, so there
    # are no dead grid steps and megacore work is balanced.
    nq = S // tq
    qi_list, kv_list = [], []
    for qi_i in range(nq):
        for kv_i in range(qi_i + 1):
            qi_list.append(qi_i)
            kv_list.append(kv_i)
    qi_idx = jnp.asarray(qi_list, dtype=jnp.int32)
    kv_idx = jnp.asarray(kv_list, dtype=jnp.int32)
    n_pairs = len(qi_list)

    flash_vmem = (2 * _pad2(tq, E) * 2          # q tiles (bf16)
                  + 3 * _pad2(tk, E) * 2        # k tiles (bf16, 3-deep)
                  + 3 * _pad2(tk, E) * 2        # v tiles (bf16, 3-deep)
                  + 2 * _pad2(E, E) * 2         # wp (bf16)
                  + 2 * _pad2(1, E) * 4         # bp
                  + 2 * _pad2(tq, E) * 4        # output tiles (f32)
                  + 2 * _pad2(tq, 1) * 4        # m, l scratch
                  + _pad2(tq, E) * 4)           # acc scratch
    flash_limit = int(min(max(2 * flash_vmem, 8 << 20), 64 << 20))

    out = pl.pallas_call(
        _flash_attn_kernel,
        out_shape=jax.ShapeDtypeStruct((B, S, E), x.dtype),
        grid_spec=pltpu.PrefetchScalarGridSpec(
            num_scalar_prefetch=2,
            grid=(B, n_pairs),
            in_specs=[
                pl.BlockSpec((1, tq, E), lambda b, t, qi, kv: (b, qi[t], 0)),
                pl.BlockSpec((1, tk, E), lambda b, t, qi, kv: (b, kv[t], 0),
                             pipeline_mode=pl.Buffered(3)),
                pl.BlockSpec((1, tk, E), lambda b, t, qi, kv: (b, kv[t], 0),
                             pipeline_mode=pl.Buffered(3)),
                pl.BlockSpec((E, E), lambda b, t, qi, kv: (0, 0)),
                pl.BlockSpec((1, E), lambda b, t, qi, kv: (0, 0)),
            ],
            out_specs=pl.BlockSpec((1, tq, E), lambda b, t, qi, kv: (b, qi[t], 0)),
            scratch_shapes=[
                pltpu.VMEM((tq, 1), jnp.float32),   # running max m
                pltpu.VMEM((tq, 1), jnp.float32),   # running denom l
                pltpu.VMEM((tq, E), jnp.float32),   # output accumulator
            ]),
        compiler_params=pltpu.CompilerParams(
            dimension_semantics=("parallel", "arbitrary"),
            vmem_limit_bytes=flash_limit),
    )(qi_idx, kv_idx, q, k, v, wp, bp)
    return out


def _reference(x, w_qkv, b_qkv, w_proj, b_proj):
    """Plain-JAX f32 reference for the correctness check."""
    B, S, E = x.shape
    qkv = x @ w_qkv + b_qkv
    q, k, v = qkv[..., :E], qkv[..., E:2 * E], qkv[..., 2 * E:]
    s = jnp.einsum("bqe,bke->bqk", q, k) / math.sqrt(E)
    mask = jnp.tril(jnp.ones((S, S), dtype=bool))
    s = jnp.where(mask[None], s, -1e30)
    p = jax.nn.softmax(s, axis=-1)
    att = jnp.einsum("bqk,bke->bqe", p, v)
    return att @ w_proj + b_proj


if __name__ == "__main__":
    B, S, E = 2, 8, 32
    key = jax.random.PRNGKey(0)
    kx, k1, k2, k3, k4 = jax.random.split(key, 5)

    x = jax.random.normal(kx, (B, S, E), dtype=jnp.float32)

    # Deterministic init mimicking nn.Linear defaults: U(-1/sqrt(fan_in), 1/sqrt(fan_in)).
    bound = 1.0 / math.sqrt(E)
    w_qkv = jax.random.uniform(k1, (E, 3 * E), jnp.float32, -bound, bound)
    b_qkv = jax.random.uniform(k2, (3 * E,), jnp.float32, -bound, bound)
    w_proj = jax.random.uniform(k3, (E, E), jnp.float32, -bound, bound)
    b_proj = jax.random.uniform(k4, (E,), jnp.float32, -bound, bound)

    out = multi_head_attention(x, w_qkv, b_qkv, w_proj, b_proj)
    out = jax.block_until_ready(out)

    ref = _reference(x, w_qkv, b_qkv, w_proj, b_proj)
    assert out.shape == (B, S, E)
    # bf16 MXU inputs with f32 accumulation -> compare at loosened tolerance.
    assert jnp.allclose(out, ref, atol=2e-2, rtol=2e-2), "mismatch vs reference"

    print("KERNEL_OK")
</pallas_src>

<mosaic_0001>
module attributes {stable_mosaic.version = 11 : i64} {
  func.func @_qkv_proj_kernel(%arg0: i32, %arg1: i32, %arg2: memref<1x8x32xf32, #tpu.memory_space<vmem>>, %arg3: memref<3x32x32xbf16, #tpu.memory_space<vmem>>, %arg4: memref<3x1x32xf32, #tpu.memory_space<vmem>>, %arg5: memref<1x8x32xbf16, #tpu.memory_space<vmem>>, %arg6: memref<1x8x32xbf16, #tpu.memory_space<vmem>>, %arg7: memref<1x8x32xbf16, #tpu.memory_space<vmem>>) attributes {dimension_semantics = [#tpu.dimension_semantics<parallel>, #tpu.dimension_semantics<parallel>], iteration_bounds = array<i64: 2, 1>, scalar_prefetch = 0 : i64, scratch_operands = 0 : i64, tpu.core_type = #tpu.core_type<tc>, window_params = [{transform_indices = @transform_0, window_bounds = array<i64: 1, 8, 32>}, {pipeline_mode = #tpu.pipeline_mode<synchronous>, transform_indices = @transform_1, window_bounds = array<i64: 3, 32, 32>}, {pipeline_mode = #tpu.pipeline_mode<synchronous>, transform_indices = @transform_2, window_bounds = array<i64: 3, 1, 32>}, {transform_indices = @transform_3, window_bounds = array<i64: 1, 8, 32>}, {transform_indices = @transform_4, window_bounds = array<i64: 1, 8, 32>}, {transform_indices = @transform_5, window_bounds = array<i64: 1, 8, 32>}]} {
    %c0 = arith.constant 0 : index
    %c0_0 = arith.constant 0 : index
    %c0_1 = arith.constant 0 : index
    %0 = vector.load %arg2[%c0, %c0_0, %c0_1] : memref<1x8x32xf32, #tpu.memory_space<vmem>>, vector<1x8x32xf32>
    %1 = vector.shape_cast %0 : vector<1x8x32xf32> to vector<8x32xf32>
    %2 = arith.truncf %1 : vector<8x32xf32> to vector<8x32xbf16>
    %c0_2 = arith.constant 0 : index
    %c0_3 = arith.constant 0 : index
    %c0_4 = arith.constant 0 : index
    %3 = vector.load %arg3[%c0_2, %c0_3, %c0_4] : memref<3x32x32xbf16, #tpu.memory_space<vmem>>, vector<1x32x32xbf16>
    %4 = vector.shape_cast %3 : vector<1x32x32xbf16> to vector<32x32xbf16>
    %cst = arith.constant dense<0.000000e+00> : vector<8x32xf32>
    %5 = tpu.matmul %2, %4, %cst {dimension_numbers = #tpu.dot_dimension_numbers<[1], [0], [0], [1], [0, 0, 1, 1], [], []>} : vector<8x32xbf16>, vector<32x32xbf16>, vector<8x32xf32> -> vector<8x32xf32>
    %c0_5 = arith.constant 0 : index
    %c0_6 = arith.constant 0 : index
    %c0_7 = arith.constant 0 : index
    %6 = vector.load %arg4[%c0_5, %c0_6, %c0_7] : memref<3x1x32xf32, #tpu.memory_space<vmem>>, vector<1x1x32xf32>
    %7 = vector.shape_cast %6 : vector<1x1x32xf32> to vector<1x32xf32>
    %8 = vector.broadcast %7 : vector<1x32xf32> to vector<8x32xf32>
    %9 = arith.addf %5, %8 : vector<8x32xf32>
    %10 = arith.truncf %9 : vector<8x32xf32> to vector<8x32xbf16>
    %c0_8 = arith.constant 0 : index
    %c0_9 = arith.constant 0 : index
    %c0_10 = arith.constant 0 : index
    %11 = vector.load %arg5[%c0_8, %c0_9, %c0_10] : memref<1x8x32xbf16, #tpu.memory_space<vmem>>, vector<1x8x32xbf16>
    %12 = vector.shape_cast %11 : vector<1x8x32xbf16> to vector<8x32xbf16>
    %13 = vector.shape_cast %10 : vector<8x32xbf16> to vector<1x8x32xbf16>
    tpu.vector_store %arg5[%c0_8, %c0_9, %c0_10], %13 {strides = array<i32>} : memref<1x8x32xbf16, #tpu.memory_space<vmem>>, vector<1x8x32xbf16>,
    %c1 = arith.constant 1 : index
    %c0_11 = arith.constant 0 : index
    %c0_12 = arith.constant 0 : index
    %14 = vector.load %arg3[%c1, %c0_11, %c0_12] : memref<3x32x32xbf16, #tpu.memory_space<vmem>>, vector<1x32x32xbf16>
    %15 = vector.shape_cast %14 : vector<1x32x32xbf16> to vector<32x32xbf16>
    %cst_13 = arith.constant dense<0.000000e+00> : vector<8x32xf32>
    %16 = tpu.matmul %2, %15, %cst_13 {dimension_numbers = #tpu.dot_dimension_numbers<[1], [0], [0], [1], [0, 0, 1, 1], [], []>} : vector<8x32xbf16>, vector<32x32xbf16>, vector<8x32xf32> -> vector<8x32xf32>
    %c1_14 = arith.constant 1 : index
    %c0_15 = arith.constant 0 : index
    %c0_16 = arith.constant 0 : index
    %17 = vector.load %arg4[%c1_14, %c0_15, %c0_16] : memref<3x1x32xf32, #tpu.memory_space<vmem>>, vector<1x1x32xf32>
    %18 = vector.shape_cast %17 : vector<1x1x32xf32> to vector<1x32xf32>
    %19 = vector.broadcast %18 : vector<1x32xf32> to vector<8x32xf32>
    %20 = arith.addf %16, %19 : vector<8x32xf32>
    %21 = arith.truncf %20 : vector<8x32xf32> to vector<8x32xbf16>
    %c0_17 = arith.constant 0 : index
    %c0_18 = arith.constant 0 : index
    %c0_19 = arith.constant 0 : index
    %22 = vector.load %arg6[%c0_17, %c0_18, %c0_19] : memref<1x8x32xbf16, #tpu.memory_space<vmem>>, vector<1x8x32xbf16>
    %23 = vector.shape_cast %22 : vector<1x8x32xbf16> to vector<8x32xbf16>
    %24 = vector.shape_cast %21 : vector<8x32xbf16> to vector<1x8x32xbf16>
    tpu.vector_store %arg6[%c0_17, %c0_18, %c0_19], %24 {strides = array<i32>} : memref<1x8x32xbf16, #tpu.memory_space<vmem>>, vector<1x8x32xbf16>,
    %c2 = arith.constant 2 : index
    %c0_20 = arith.constant 0 : index
    %c0_21 = arith.constant 0 : index
    %25 = vector.load %arg3[%c2, %c0_20, %c0_21] : memref<3x32x32xbf16, #tpu.memory_space<vmem>>, vector<1x32x32xbf16>
    %26 = vector.shape_cast %25 : vector<1x32x32xbf16> to vector<32x32xbf16>
    %cst_22 = arith.constant dense<0.000000e+00> : vector<8x32xf32>
    %27 = tpu.matmul %2, %26, %cst_22 {dimension_numbers = #tpu.dot_dimension_numbers<[1], [0], [0], [1], [0, 0, 1, 1], [], []>} : vector<8x32xbf16>, vector<32x32xbf16>, vector<8x32xf32> -> vector<8x32xf32>
    %c2_23 = arith.constant 2 : index
    %c0_24 = arith.constant 0 : index
    %c0_25 = arith.constant 0 : index
    %28 = vector.load %arg4[%c2_23, %c0_24, %c0_25] : memref<3x1x32xf32, #tpu.memory_space<vmem>>, vector<1x1x32xf32>
    %29 = vector.shape_cast %28 : vector<1x1x32xf32> to vector<1x32xf32>
    %30 = vector.broadcast %29 : vector<1x32xf32> to vector<8x32xf32>
    %31 = arith.addf %27, %30 : vector<8x32xf32>
    %32 = arith.truncf %31 : vector<8x32xf32> to vector<8x32xbf16>
    %c0_26 = arith.constant 0 : index
    %c0_27 = arith.constant 0 : index
    %c0_28 = arith.constant 0 : index
    %33 = vector.load %arg7[%c0_26, %c0_27, %c0_28] : memref<1x8x32xbf16, #tpu.memory_space<vmem>>, vector<1x8x32xbf16>
    %34 = vector.shape_cast %33 : vector<1x8x32xbf16> to vector<8x32xbf16>
    %35 = vector.shape_cast %32 : vector<8x32xbf16> to vector<1x8x32xbf16>
    tpu.vector_store %arg7[%c0_26, %c0_27, %c0_28], %35 {strides = array<i32>} : memref<1x8x32xbf16, #tpu.memory_space<vmem>>, vector<1x8x32xbf16>,
    return
  }
  func.func @transform_0(%arg0: i32, %arg1: i32) -> (i32, i32, i32) {
    %c0_i32 = arith.constant 0 : i32
    %c0_i32_0 = arith.constant 0 : i32
    return %arg0, %arg1, %c0_i32 : i32, i32, i32
  }
  func.func @transform_1(%arg0: i32, %arg1: i32) -> (i32, i32, i32) {
    %c0_i32 = arith.constant 0 : i32
    %c0_i32_0 = arith.constant 0 : i32
    %c0_i32_1 = arith.constant 0 : i32
    %c0_i32_2 = arith.constant 0 : i32
    return %c0_i32, %c0_i32_0, %c0_i32_1 : i32, i32, i32
  }
  func.func @transform_2(%arg0: i32, %arg1: i32) -> (i32, i32, i32) {
    %c0_i32 = arith.constant 0 : i32
    %c0_i32_0 = arith.constant 0 : i32
    %c0_i32_1 = arith.constant 0 : i32
    %c0_i32_2 = arith.constant 0 : i32
    return %c0_i32, %c0_i32_0, %c0_i32_1 : i32, i32, i32
  }
  func.func @transform_3(%arg0: i32, %arg1: i32) -> (i32, i32, i32) {
    %c0_i32 = arith.constant 0 : i32
    %c0_i32_0 = arith.constant 0 : i32
    return %arg0, %arg1, %c0_i32 : i32, i32, i32
  }
  func.func @transform_4(%arg0: i32, %arg1: i32) -> (i32, i32, i32) {
    %c0_i32 = arith.constant 0 : i32
    %c0_i32_0 = arith.constant 0 : i32
    return %arg0, %arg1, %c0_i32 : i32, i32, i32
  }
  func.func @transform_5(%arg0: i32, %arg1: i32) -> (i32, i32, i32) {
    %c0_i32 = arith.constant 0 : i32
    %c0_i32_0 = arith.constant 0 : i32
    return %arg0, %arg1, %c0_i32 : i32, i32, i32
  }
}

</mosaic_0001>

<bundles_post_ra>
// kernel: tpu_custom_call.1
= control target key start
LH: loop header
LB: loop body
LE: loop exit
PB: predicated region body
PF: predicated region fallthrough
CT: control target
= control target key end

     0   :  { %s1421_s0 = inlined_call_operand.hbm [shape: f32[2,8,32], index: 0, kind: input, shape index: {}]   ;;  %s1422_s1 = inlined_call_operand.hbm [shape: bf16[3,32,32], index: 1, kind: input, shape index: {}]   ;;  %s1423_s2 = inlined_call_operand.vmem [shape: f32[3,1,32], index: 2, kind: input, shape index: {}]   ;;  %s1424_s3 = inlined_call_operand.hbm [shape: bf16[2,8,32], index: 3, kind: output, shape index: {0}]   ;;  %s1425_s4 = inlined_call_operand.hbm [shape: bf16[2,8,32], index: 4, kind: output, shape index: {1}]   ;;  %s1426_s5 = inlined_call_operand.hbm [shape: bf16[2,8,32], index: 5, kind: output, shape index: {2}]  }
   0x1   :  { %1432 = sst [smem:[#allocation15_spill]] %s1421_s0 }
   0x2   :  { %11 = vsyncpa [#allocation3], 0 }
   0x3   :  { %13 = vsyncpa [#allocation3 + $0x1], 0 }
   0x4   :  { %14 = vsyncpa [#allocation6], 0 }
   0x5   :  { %15 = vsyncpa [#allocation4], 0 }
   0x6   :  { %17 = vsyncpa [#allocation4 + $0x1], 0 }
   0x7   :  { %18 = vsyncpa [#allocation9], 0 }
   0x8   :  { %20 = vsyncpa [#allocation9 + $0x1], 0  ;;  %s1113_s18 = smov 0   ;;  %s1115_s19 = smov 0  }
   0x9   :  { %s1117_s20 = smov 0   ;;  %s1119_s21 = smov 0  }
   0xa   :  { %s1121_s22 = smov 0   ;;  %s1123_s23 = smov 0  }
   0xb LB: > { %s1144_s24 = sadd.s32 4294967295, %s1072_s23   ;;  %s1430_s25 = sadd.s32 4294967294, %s1072_s23   ;;  %s1072_s23 = sphi %s1123_s23, %s26_s23   ;;  %s1068_s22 = sphi %s1121_s22, %s1455_s22   ;;  %s1064_s21 = sphi %s1119_s21, %s1454_s21   ;;  %s1060_s20 = sphi %s1117_s20, %s1453_s20   ;;  %s1056_s19 = sphi %s1115_s19, %s1452_s19   ;;  %s1052_s18 = sphi %s1113_s18, %s1451_s18  }
   0xc   : > { %p60_p0 = scmp.ne.s32.totalorder %s1056_s19, %s1052_s18  ;;  %p1427_p1 = scmp.eq.s32.totalorder %s1144_s24, 0 }
   0xd   : > { %p134_p3 = scmp.eq.s32.totalorder %s1430_s25, 1  ;;  %p709_p5 = scmp.ge.s32.totalorder %s1072_s23, 1 }
   0xe   : > { %p1155_p4 = por %p1427_p1, %p60_p0  ;;  %p197_p7 = scmp.lt.s32.totalorder %s1072_s23, 3 }
   0xf   : > { %p1160_p6 = por %p134_p3, %p60_p0  ;;  %s1074_s29 = smov [#allocation5]  }
  0x10   : > { %s1433_s26 = scalar_select %p1155_p4, 1, 0 }
  0x11   : > { %s1434_s27 = scalar_select %p1160_p6, 1, 0 }
  0x12   : > { %p1165_p8 = pnand %p709_p5, %p197_p7  ;;  %s209_s30 = sshll.u32 %s1074_s29, 4  ;;  %s210_s30 = int_to_ptr.vmem [resolvable:$true] %s209_s30 }
  0x13   : > { %s38_s7 = sadd.s32 1, %s1068_s22  ;;  %s868_s10 = scalar_lea.hbm %s1422_s1, 768 }
  0x14   : > { %s1435_s28 = scalar_select %p1165_p8, 1, 0 }
  0x15   : > { %p787_p9 = pneg %p1165_p8  ;;  %p869_p12 = scmp.ne.s32.totalorder %s1422_s1, %s868_s10 }
  0x16   : > { %p875_p5 = scmp.lt.u32.totalorder %s868_s10, %s1422_s1 }
  0x17   : > { %p1174_p11 = pnand %p787_p9, %p1427_p1 }
  0x19   : > { %p870_p13 = pneg %p1174_p11 }
  0x1b   : > { %p871_p0 = pnand %p870_p13, %p869_p12 }
  0x1d   : > { %p872_p3 = pneg %p871_p0 }
  0x1f   : > { %p877_p7 = pnand %p875_p5, %p872_p3 }
  0x21   : > { %880 = shalt.err (!%p877_p7)
}
  0x22   : > { %s881_s15 = scalar_lea.vmem %s210_s30, 768  ;;  %p889_p2 = scmp.lt.s32.totalorder %s210_s30, %s210_s30 }
  0x23   : > { %p882_p9 = scmp.ne.s32.totalorder %s210_s30, %s881_s15  ;;  %p890_p6 = scmp.lt.s32.totalorder %s881_s15, %s881_s15 }
  0x25   : > { %p884_p10 = pnand %p882_p9, %p870_p13  ;;  %p891_p4 = por %p890_p6, %p889_p2 }
  0x27   : > { %p885_p1 = pneg %p884_p10 }
  0x29   : > { %p892_p8 = pnand %p891_p4, %p885_p1 }
  0x2b   : > { %895 = shalt.err (!%p892_p8)
}
  0x2c   : > { %s1075_s16 = smov 64   ;;  %s1076_s17 = smov 4  }
  0x2d   : > { %790 = dma.hbm_to_vmem [thread:$0]  (!%p1174_p11), %s1422_s1, 768, %s210_s30, [#allocation6], %s1075_s16, %s1075_s16, %s1076_s17  }
  0x2e   : > { %p40_p1 = scmp.ge.s32.totalorder %s38_s7, 2  ;;  %s47_s9 = sadd.s32 1, %s1060_s20 }
  0x2f   : > { %p54_p2 = scmp.ne.s32.totalorder %s1060_s20, %s1056_s19  ;;  %p55_p4 = scmp.eq.s32.totalorder %s1072_s23, 0 }
  0x30   : > { %s1457_s7 = smov (%p40_p1, %s38_s7), 0  ;;  %p1438_p8 = scmp.eq.s32.totalorder %s1144_s24, 1 }
  0x31   : > { %p1201_p6 = por %p55_p4, %p54_p2  ;;  %s42_s6 = ssub.s32 %s1068_s22, %s1457_s7 }
  0x32   : > { %p1207_p10 = por %p1438_p8, %p54_p2  ;;  %p806_p12 = scmp.lt.s32.totalorder %s1072_s23, 2 }
  0x33   : > { %p45_p11 = scmp.eq.s32.totalorder %s42_s6, 0  ;;  %s226_s30 = sand.u32 1, %s1060_s20  }
  0x34   : > { %s712_s12 = sshll.u32 %s226_s30, 3  ;;  %s713_s14 = sshll.u32 %s1068_s22, 7 }
  0x35   : > { %s1216_s13 = scalar_select %p45_p11, %s1060_s20, %s47_s9  }
  0x36   : > { %s1440_s0 = sld [smem:[#allocation15_spill]]  ;;  %s230_s29 = scalar_lea.vmem [#allocation2], %s712_s12 }
  0x37   : > { %s238_s8 = sshll.u32 %s230_s29, 4  ;;  %p1228_p13 = pnand %p806_p12, %p1201_p6  ;;  %s1224_s8 = int_to_ptr.vmem [resolvable:$true] %s238_s8 }
  0x38   : > { %s227_s9 = scalar_lea.sflag [#allocation3], %s226_s30 }
  0x39   : > { %p898_p3 = pneg %p1228_p13 }
  0x3c   : > { %s1222_s17 = scalar_lea.hbm %s1440_s0, %s713_s14  ;;  %s901_s15 = scalar_lea.hbm %s1440_s0, 256 }
  0x3d   : > { %s896_s25 = scalar_lea.hbm %s1222_s17, 128  ;;  %p902_p9 = scmp.lt.u32.totalorder %s1222_s17, %s1440_s0 }
  0x3e   : > { %p897_p0 = scmp.ne.s32.totalorder %s1222_s17, %s896_s25  ;;  %p903_p1 = scmp.lt.u32.totalorder %s901_s15, %s896_s25 }
  0x3f   : > { %p905_p4 = scmp.lt.u32.totalorder %s896_s25, %s1222_s17 }
  0x40   : > { %p899_p5 = pnand %p898_p3, %p897_p0  ;;  %p904_p2 = por %p903_p1, %p902_p9 }
  0x42   : > { %p900_p7 = pneg %p899_p5  ;;  %p906_p6 = por %p905_p4, %p904_p2 }
  0x44   : > { %p907_p8 = pnand %p906_p6, %p900_p7 }
  0x46   : > { %910 = shalt.err (!%p907_p8)
}
  0x47   : > { %s911_s30 = scalar_lea.vmem %s1224_s8, 128  ;;  %s1077_s29 = smov [#allocation2]  }
  0x48   : > { %p912_p12 = scmp.ne.s32.totalorder %s1224_s8, %s911_s30  ;;  %s916_s12 = sshll.u32 %s1077_s29, 4  ;;  %s917_s12 = int_to_ptr.vmem [resolvable:$false] %s916_s12 }
  0x49   : > { %s918_s14 = scalar_lea.vmem %s917_s12, 256  ;;  %p919_p5 = scmp.lt.s32.totalorder %s1224_s8, %s917_s12 }
  0x4a   : > { %p914_p11 = pnand %p912_p12, %p898_p3  ;;  %p920_p9 = scmp.lt.s32.totalorder %s918_s14, %s911_s30 }
  0x4c   : > { %p915_p0 = pneg %p914_p11  ;;  %p921_p1 = por %p920_p9, %p919_p5 }
  0x4e   : > { %p922_p2 = pnand %p921_p1, %p915_p0 }
  0x50   : > { %925 = shalt.err (!%p922_p2)
}
  0x51   : > { %794 = dma.hbm_to_vmem [thread:$0]  (!%p1228_p13), %s1222_s17, 128, %s1224_s8, %s227_s9  }
  0x52   : > { %p1442_p7 = scmp.ne.s32.totalorder %s1435_s28, 0 }
  0x53   : > { %s1260_s25 = sand.u32 (!%p1442_p7), 1, %s1056_s19   ;;  %p1443_p3 = scmp.ne.s32.totalorder (!%p1442_p7), %s1433_s26, 0 }
  0x54   : > { %247 = sbr.rel (%p1442_p7) target bundleno = 383 (0x17f), region = 32  ;;  %s715_s15 = sshll.u32 (!%p1442_p7), %s1260_s25, 3 }
  0x55   : > { %s250_s10 = scalar_lea.sflag (!%p1442_p7), [#allocation3], %s1260_s25  ;;  %s253_s16 = scalar_lea.vmem (!%p1442_p7), [#allocation2], %s715_s15 }
  0x5b   : > { %1035 = dma.done.wait (%p1443_p3), %s250_s10, 128  }
  0x5c   : > { %1037 = vsyncadd (%p1443_p3), %s250_s10, 4294967168  ;;  %p1444_p4 = scmp.eq.s32.totalorder %s1144_s24, 0 }
  0x5e   : > { %1039 = dma.done.wait (%p1444_p4), [#allocation6], 768   ;;  %p1445_p13 = pmov %p1444_p4 }
  0x5f   : > { %v1078_v0 = vmov 0.0   ;;  %vm1079_vm0 = vmmov 0   ;;  %v862_v1 = vld [vmem:[#allocation5] sm:$0xff]   ;;  %v863_v2 = vld [vmem:[#allocation5 + $0x8] sm:$0xff]   ;;  %v864_v3 = vld [vmem:[#allocation5 + $0x10] sm:$0xff]   ;;  %vm320_vm1 = vcmask 261120  }
  0x60   : > { %1041 = vsyncadd (%p1445_p13), [#allocation6], 4294966528  ;;  %751 = vmatprep.subr.bf16.mxu0 %v1078_v0  ;;  %759 = vmatprep.subr.bf16.mxu1 %v1078_v0  ;;  %v295_v4 = vld [vmem:[%s253_s16] sm:$0xff]  ;;  %v865_v7 = vld [vmem:[#allocation5 + $0x20] sm:$0xff]   ;;  %s1276_s26 = sshll.u32 %s1260_s25, 2  ;;  %s1285_s9 = sshll.u32 %s1064_s21, 6 }
  0x61   : > { %755 = vmatprep.mubr.msk.bf16.mxu0 %vm1079_vm0, %v1078_v0  ;;  %763 = vmatprep.mubr.msk.bf16.mxu1 %vm1079_vm0, %v1078_v0  ;;  %v296_v5 = vpack.c.bf16 %v295_v4, %v295_v4  ;;  %v866_v6 = vld [vmem:[#allocation5 + $0x18] sm:$0xff]   ;;  %v867_v8 = vld [vmem:[#allocation5 + $0x28] sm:$0xff]   ;;  %v720_v9 = vld [vmem:[%s1423_s2] ss:$0 sm:$0xff]  ;;  %s279_s30 = scalar_lea.vmem [#allocation7], %s1276_s26  ;;  %vm365_vm2 = vcmask 257024   ;;  %s1296_s16 = scalar_lea.hbm %s1424_s3, %s1285_s9 }
  0x62   : > { %752 = vmatpush3.bf16.msra.mxu0 %v862_v1  ;;  %760 = vmatpush3.bf16.msra.mxu1 %v864_v3  ;;  %v725_v11 = vld [vmem:[%s1423_s2 + $0x1] ss:$0 sm:$0xff]  ;;  %s526_s29 = sshll.u32 %s279_s30, 4  ;;  %s1431_s14 = scalar_lea.vmem [#allocation8], %s1276_s26  ;;  %v730_v23 = vld [vmem:[%s1423_s2 + $0x2] ss:$0 sm:$0xff]  ;;  %s1298_s29 = int_to_ptr.vmem [resolvable:$true] %s526_s29 }
  0x63   : > { %753 = vmatprep.subr.bf16.mxu0 %v1078_v0  ;;  %761 = vmatprep.subr.bf16.mxu1 %v1078_v0  ;;  %s540_s15 = sshll.u32 %s1431_s14, 4  ;;  %s1304_s8 = scalar_lea.hbm %s1425_s4, %s1285_s9  ;;  %s1306_s15 = int_to_ptr.vmem [resolvable:$true] %s540_s15 }
  0x64   : > { %s502_s10 = scalar_lea.sflag [#allocation4], %s1260_s25  ;;  %s926_s12 = scalar_lea.vmem %s1298_s29, 64 }
  0x65   : > { %p927_p6 = scmp.ne.s32.totalorder %s1298_s29, %s926_s12  ;;  %s1080_s14 = smov [#allocation7]  }
  0x66   : > { %754 = vmatpush3.bf16.msra.mxu0 %v863_v2  ;;  %762 = vmatpush3.bf16.msra.mxu1 %v866_v6  ;;  %s930_s0 = sshll.u32 %s1080_s14, 4  ;;  %s931_s0 = int_to_ptr.vmem [resolvable:$false] %s930_s0 }
  0x67   : > { %767 = vmatprep.subr.bf16.mxu0 %v1078_v0  ;;  %p928_p8 = pnand %p927_p6, %p1207_p10  ;;  %s932_s28 = scalar_lea.vmem %s931_s0, 128 }
  0x68   : > { %p933_p11 = scmp.lt.s32.totalorder %s1298_s29, %s931_s0  ;;  %p934_p0 = scmp.lt.s32.totalorder %s932_s28, %s926_s12 }
  0x69   : > { %756 = vmatmul.mubr.msk.bf16.vlgmr.msra.gmra.mrb[0].mxu0 %vm320_vm1, %v296_v5  ;;  %764 = vmatmul.mubr.msk.bf16.vlgmr.msra.gmra.mrb[0].mxu1 %vm320_vm1, %v296_v5  ;;  %p929_p12 = pneg %p928_p8 }
  0x6a   : > { %768 = vmatpush3.bf16.msra.mxu0 %v865_v7  ;;  %771 = vmatprep.mubr.msk.bf16.mxu0 %vm1079_vm0, %v1078_v0  ;;  %p935_p5 = por %p934_p0, %p933_p11 }
  0x6b   : > { %769 = vmatprep.subr.bf16.mxu0 %v1078_v0 }
  0x6c   : > { %p936_p9 = pnand %p935_p5, %p929_p12 }
  0x6e   : > { %770 = vmatpush3.bf16.msra.mxu0 %v867_v8 }
  0x71   : > { %772 = vmatmul.mubr.msk.bf16.vlgmr.msra.gmra.mrb[4].mxu0 %vm320_vm1, %v296_v5 }
 0x13c   : > { %v358_v10 = vpop.f32.mrb[0].mxu0  ;;  %v426_v15 = vpop.f32.mrb[0].mxu1 }
 0x13d   : > { %v359_v12 = vadd.f32 %v720_v9, %v358_v10  ;;  %v757_v13 = vpop.f32.mrb[1].mxu0  ;;  %v427_v18 = vadd.f32 %v725_v11, %v426_v15  ;;  %v765_v19 = vpop.f32.mrb[1].mxu1 }
 0x13e   : > { %v361_v14 = vpop.f32.mrb[2].mxu0  ;;  %v429_v20 = vpop.f32.mrb[2].mxu1 }
 0x13f   : > { %v364_v16 = vpack.c.bf16 %v359_v12, %v359_v12  ;;  %v758_v17 = vpop.f32.mrb[3].mxu0  ;;  %v432_v21 = vpack.c.bf16 %v427_v18, %v427_v18  ;;  %v766_v22 = vpop.f32.mrb[3].mxu1 }
 0x141   : > { %366 = vst.msk [vmem:[%s279_s30] sm:$0xf] %vm365_vm2, %v364_v16 }
 0x142   : > { %939 = shalt.err (!%p936_p9)
}
 0x143   : > { %s940_s25 = scalar_lea.hbm %s1296_s16, 64  ;;  %s944_s14 = scalar_lea.hbm %s1424_s3, 128 }
 0x144   : > { %p941_p1 = scmp.ne.s32.totalorder %s1296_s16, %s940_s25  ;;  %p945_p3 = scmp.lt.u32.totalorder %s1296_s16, %s1424_s3 }
 0x145   : > { %p946_p4 = scmp.lt.u32.totalorder %s944_s14, %s940_s25  ;;  %p948_p6 = scmp.lt.u32.totalorder %s940_s25, %s1296_s16 }
 0x146   : > { %p942_p2 = pnand %p941_p1, %p1207_p10 }
 0x147   : > { %p947_p13 = por %p946_p4, %p945_p3 }
 0x148   : > { %p943_p7 = pneg %p942_p2 }
 0x149   : > { %p949_p8 = por %p948_p6, %p947_p13 }
 0x14b   : > { %p950_p12 = pnand %p949_p8, %p943_p7 }
 0x14d   : > { %953 = shalt.err (!%p950_p12)
}
 0x14e   : > { %781 = dma.vmem_to_hbm [thread:$0]  (%p1207_p10), %s1298_s29, 64, %s1296_s16, %s502_s10   ;;  %v493_v24 = vpop.f32.mrb[4].mxu0 }
 0x14f   : > { %s1446_s12 = scalar_lea.vmem [#allocation8], %s1276_s26  ;;  %s293_s21 = scalar_lea.vmem [#allocation10], %s1276_s26 }
 0x150   : > { %433 = vst.msk [vmem:[%s1446_s12] sm:$0xf] %vm365_vm2, %v432_v21  ;;  %s1340_s28 = sshll.u32 %s293_s21, 4  ;;  %s1447_s25 = sand.u32 1, %s1144_s24   ;;  %s555_s28 = int_to_ptr.vmem [resolvable:$true] %s1340_s28 }
 0x151   : > { %s1344_s30 = scalar_lea.sflag [#allocation9], %s1447_s25  ;;  %s954_s17 = scalar_lea.vmem %s1306_s15, 64 }
 0x152   : > { %p955_p11 = scmp.ne.s32.totalorder %s1306_s15, %s954_s17  ;;  %s1081_s14 = smov [#allocation8]  }
 0x153   : > { %s958_s6 = sshll.u32 %s1081_s14, 4  ;;  %s959_s6 = int_to_ptr.vmem [resolvable:$false] %s958_s6 }
 0x154   : > { %p956_p0 = pnand %p955_p11, %p1207_p10  ;;  %s960_s29 = scalar_lea.vmem %s959_s6, 128 }
 0x155   : > { %p961_p9 = scmp.lt.s32.totalorder %s1306_s15, %s959_s6  ;;  %p962_p1 = scmp.lt.s32.totalorder %s960_s29, %s954_s17 }
 0x156   : > { %p957_p5 = pneg %p956_p0 }
 0x157   : > { %p963_p2 = por %p962_p1, %p961_p9 }
 0x159   : > { %p964_p7 = pnand %p963_p2, %p957_p5 }
 0x15b   : > { %967 = shalt.err (!%p964_p7)
}
 0x15c   : > { %s968_s24 = scalar_lea.hbm %s1304_s8, 64  ;;  %s972_s0 = scalar_lea.hbm %s1425_s4, 128 }
 0x15d   : > { %p969_p3 = scmp.ne.s32.totalorder %s1304_s8, %s968_s24  ;;  %p973_p6 = scmp.lt.u32.totalorder %s1304_s8, %s1425_s4 }
 0x15e   : > { %p974_p8 = scmp.lt.u32.totalorder %s972_s0, %s968_s24  ;;  %p976_p11 = scmp.lt.u32.totalorder %s968_s24, %s1304_s8 }
 0x15f   : > { %p970_p4 = pnand %p969_p3, %p1207_p10 }
 0x160   : > { %p975_p12 = por %p974_p8, %p973_p6 }
 0x161   : > { %p971_p13 = pneg %p970_p4 }
 0x162   : > { %p977_p0 = por %p976_p11, %p975_p12 }
 0x164   : > { %p978_p5 = pnand %p977_p0, %p971_p13 }
 0x166   : > { %981 = shalt.err (!%p978_p5)
}
 0x167   : > { %782 = dma.vmem_to_hbm [thread:$0]  (%p1207_p10), %s1306_s15, 64, %s1304_s8, %s1344_s30   ;;  %v494_v25 = vadd.f32 %v730_v23, %v493_v24  ;;  %v773_v26 = vpop.f32.mrb[5].mxu0 }
 0x168   : > { %v496_v27 = vpop.f32.mrb[6].mxu0  ;;  %s1372_s6 = scalar_lea.hbm %s1426_s5, %s1285_s9  ;;  %s982_s29 = scalar_lea.vmem %s555_s28, 64 }
 0x169   : > { %v499_v28 = vpack.c.bf16 %v494_v25, %v494_v25  ;;  %v774_v29 = vpop.f32.mrb[7].mxu0  ;;  %p983_p9 = scmp.ne.s32.totalorder %s555_s28, %s982_s29  ;;  %s1082_s15 = smov [#allocation10]  }
 0x16a   : > { %s986_s8 = sshll.u32 %s1082_s15, 4  ;;  %s987_s8 = int_to_ptr.vmem [resolvable:$false] %s986_s8 }
 0x16b   : > { %500 = vst.msk [vmem:[%s293_s21] sm:$0xf] %vm365_vm2, %v499_v28  ;;  %p984_p1 = pnand %p983_p9, %p1207_p10  ;;  %s988_s24 = scalar_lea.vmem %s987_s8, 128 }
 0x16c   : > { %p989_p7 = scmp.lt.s32.totalorder %s555_s28, %s987_s8  ;;  %p990_p3 = scmp.lt.s32.totalorder %s988_s24, %s982_s29 }
 0x16d   : > { %p985_p2 = pneg %p984_p1 }
 0x16e   : > { %p991_p4 = por %p990_p3, %p989_p7 }
 0x170   : > { %p992_p13 = pnand %p991_p4, %p985_p2 }
 0x172   : > { %995 = shalt.err (!%p992_p13)
}
 0x173   : > { %s996_s26 = scalar_lea.hbm %s1372_s6, 64  ;;  %s1000_s16 = scalar_lea.hbm %s1426_s5, 128 }
 0x174   : > { %p997_p6 = scmp.ne.s32.totalorder %s1372_s6, %s996_s26  ;;  %p1001_p11 = scmp.lt.u32.totalorder %s1372_s6, %s1426_s5 }
 0x175   : > { %p1002_p0 = scmp.lt.u32.totalorder %s1000_s16, %s996_s26  ;;  %p1004_p9 = scmp.lt.u32.totalorder %s996_s26, %s1372_s6 }
 0x176   : > { %p998_p8 = pnand %p997_p6, %p1207_p10 }
 0x177   : > { %p1003_p5 = por %p1002_p0, %p1001_p11 }
 0x178   : > { %p999_p12 = pneg %p998_p8 }
 0x179   : > { %p1005_p1 = por %p1004_p9, %p1003_p5 }
 0x17b   : > { %p1006_p2 = pnand %p1005_p1, %p999_p12 }
 0x17d   : > { %1009 = shalt.err (!%p1006_p2)
}
 0x17e   : > { %783 = dma.vmem_to_hbm [thread:$0]  (%p1207_p10), %s555_s28, 64, %s1372_s6, %s1344_s30  }
 0x17f PF: > { %s566_s12 = sand.u32 1, %s1052_s18   ;;  %p1448_p7 = scmp.ne.s32.totalorder %s1434_s27, 0 }
 0x180   : > { %p1449_p3 = scmp.ge.s32.totalorder %s1072_s23, 2  ;;  %s567_s25 = scalar_lea.sflag [#allocation4], %s566_s12 }
 0x182   : > { %p796_p4 = pnand %p1449_p3, %p1448_p7 }
 0x184   : > { %1043 = dma.done.wait (!%p796_p4), %s567_s25, 64  }
 0x185   : > { %1045 = vsyncadd (!%p796_p4), %s567_s25, 4294967232  ;;  %s1450_s17 = sadd.s32 4294967294, %s1072_s23  }
 0x186   : > { %s575_s14 = sand.u32 1, %s1450_s17  }
 0x187   : > { %s576_s29 = scalar_lea.sflag [#allocation9], %s575_s14 }
 0x188   : > { %1047 = dma.done.wait (!%p796_p4), %s576_s29, 128  }
 0x189   : > { %1049 = vsyncadd (!%p796_p4), %s576_s29, 4294967168  ;;  %s26_s23 = sadd.s32 1, %s1072_s23   ;;  %s1451_s18 = smov %s1056_s19 }
 0x18a   : > { %p23_p10 = scmp.ge.s32.totalorder %s26_s23, 4   ;;  %s1452_s19 = smov %s1060_s20 }
 0x18b   : > { %s1453_s20 = smov %s1216_s13  ;;  %s1454_s21 = smov %s1068_s22 }
 0x18c   : > { %s1455_s22 = smov %s1457_s7  ;;  %25 = sbr.rel (!%p23_p10) target bundleno = 11 (0xb), region = 117 }
 0x193   :  { %590 = vsyncpa [#allocation3], 1 }
 0x194   :  { %592 = vsyncpa [#allocation3 + $0x1], 1 }
 0x195   :  { %593 = vsyncpa [#allocation6], 1 }
 0x196   :  { %594 = vsyncpa [#allocation4], 1 }
 0x197   :  { %596 = vsyncpa [#allocation4 + $0x1], 1 }
 0x198   :  { %597 = vsyncpa [#allocation9], 1 }
 0x199   :  { %599 = vsyncpa [#allocation9 + $0x1], 1 }

</bundles_post_ra>
